<compile_context>
chip_gen: v5e
topology: v5e:2x2
jax: 0.10.0
libtpu: 0.0.40
codegen_flags: <defaults>
</compile_context>

<pallas_src>
import jax
import jax.numpy as jnp
from jax.experimental import pallas as pl
from jax.experimental.pallas import tpu as pltpu


def _mlp_kernel(x_ref, w1_ref, b1_ref, w2_ref, b2_ref, ot_ref):
    # x : (TB, 6)  natural batch-major tile (batch on sublanes)
    # w1: (H, 6), b1: (H, 1), w2: (4, H), b2: (4, 1)   (PyTorch layout)
    # ot: (4, TB)  feature-major, batch on the 128-lane axis (lane-dense store)
    x = x_ref[...]
    w1 = w1_ref[...]
    w2 = w2_ref[...]

    # ---- layer 1 on the MXU: h[h, b] = sum_k w1[h, k] * x[b, k] ----
    # Contract the shared feature axis (dim 1 of both operands) so the result
    # comes out feature-major (H, TB) with the batch lane-dense; no explicit
    # transpose of the x tile is needed (the MXU takes the transposed operand).
    h = jax.lax.dot_general(
        w1, x,
        dimension_numbers=(((1,), (1,)), ((), ())),
        preferred_element_type=jnp.float32,
        precision=jax.lax.Precision.HIGHEST,
    )
    h = jnp.maximum(h + b1_ref[...], 0.0)          # bias + ReLU on the VPU

    # ---- layer 2 on the MXU: out[o, b] = sum_j w2[o, j] * h[j, b] ----
    out = jnp.dot(
        w2, h,
        preferred_element_type=jnp.float32,
        precision=jax.lax.Precision.HIGHEST,
    ) + b2_ref[...]

    ot_ref[...] = out.astype(ot_ref.dtype)         # lane-dense (4, TB) store


def simple_relu_nn_forward(x, w1, b1, w2, b2, *, tb=8192):
    """x: (B, 6) f32 -> (B, 4) f32.

    w1: (H, 6), b1: (H,), w2: (4, H), b2: (4,)  (PyTorch nn.Linear layout).
    `tb` is the batch tile; it is rounded to a multiple of 128 (lane width)
    and capped so the grid has at least two tiles when B > 128 (v7x has two
    TensorCores sharing the "parallel" grid axis).
    """
    B, k_in = x.shape
    hdim = w1.shape[0]
    n_out = w2.shape[0]

    # --- batch tile selection ---
    b128 = pl.cdiv(B, 128) * 128                     # batch rounded to lane width
    tb = max(128, (min(tb, b128) // 128) * 128)      # multiple of 128, no over-pad
    if b128 >= 2 * 128:
        # keep >=2 batch tiles so both v7x TensorCores get work
        tb = min(tb, pl.cdiv(b128, 2 * 128) * 128)
    b_pad = pl.cdiv(B, tb) * tb
    grid = (b_pad // tb,)

    # --- wrapper-side prep: no transposes, only a (usually tiny) batch pad ---
    xf = x.astype(jnp.float32)
    if b_pad != B:
        xf = jnp.pad(xf, ((0, b_pad - B), (0, 0)))   # padded rows are sliced off
    w1f = w1.astype(jnp.float32)
    w2f = w2.astype(jnp.float32)
    b1_col = b1.reshape(hdim, 1).astype(jnp.float32)
    b2_col = b2.reshape(n_out, 1).astype(jnp.float32)

    out_t = pl.pallas_call(
        _mlp_kernel,
        out_shape=jax.ShapeDtypeStruct((n_out, b_pad), jnp.float32),
        grid=grid,
        in_specs=[
            pl.BlockSpec((tb, k_in), lambda i: (i, 0)),     # x batch tile (natural layout)
            pl.BlockSpec((hdim, k_in), lambda i: (0, 0)),   # w1 VMEM-resident
            pl.BlockSpec((hdim, 1), lambda i: (0, 0)),      # b1 VMEM-resident
            pl.BlockSpec((n_out, hdim), lambda i: (0, 0)),  # w2 VMEM-resident
            pl.BlockSpec((n_out, 1), lambda i: (0, 0)),     # b2 VMEM-resident
        ],
        out_specs=pl.BlockSpec((n_out, tb), lambda i: (0, i)),
        compiler_params=pltpu.CompilerParams(
            dimension_semantics=("parallel",),              # shard batch tiles across TCs
        ),
    )(xf, w1f, b1_col, w2f, b2_col)

    # Final (4, B_pad) -> (B, 4): the only remaining wrapper layout op, kept to
    # preserve the nn.Module contract.  Consumers that accept out^T should use
    # the kernel output directly and skip this pass.
    return out_t[:, :B].T


def init_params(key, hidden_neurons):
    """Deterministic init matching nn.Linear (uniform +-1/sqrt(fan_in)),
    kept in the native PyTorch layout: w1 (H, 6), w2 (4, H)."""
    k1, k2, k3, k4 = jax.random.split(key, 4)
    lim1 = 1.0 / jnp.sqrt(6.0)
    lim2 = 1.0 / jnp.sqrt(float(hidden_neurons))
    w1 = jax.random.uniform(k1, (hidden_neurons, 6), jnp.float32, -lim1, lim1)
    b1 = jax.random.uniform(k2, (hidden_neurons,), jnp.float32, -lim1, lim1)
    w2 = jax.random.uniform(k3, (4, hidden_neurons), jnp.float32, -lim2, lim2)
    b2 = jax.random.uniform(k4, (4,), jnp.float32, -lim2, lim2)
    return w1, b1, w2, b2


if __name__ == "__main__":
    key = jax.random.PRNGKey(0)
    k_x, k_p = jax.random.split(key)

    batch = 300            # not a multiple of 128: exercises padding + 2-tile grid
    hidden_neurons = 32

    x = jax.random.normal(k_x, (batch, 6), jnp.float32)
    w1, b1, w2, b2 = init_params(k_p, hidden_neurons)

    fwd = jax.jit(simple_relu_nn_forward, static_argnames=("tb",))
    out = jax.block_until_ready(fwd(x, w1, b1, w2, b2))

    # reference in plain JAX (same math as the PyTorch module), matched precision
    h_ref = jnp.maximum(jnp.dot(x, w1.T, precision="highest") + b1, 0.0)
    ref = jnp.dot(h_ref, w2.T, precision="highest") + b2

    assert out.shape == (batch, 4)
    assert jnp.allclose(out, ref, atol=1e-5, rtol=1e-5)

    print("KERNEL_OK")
</pallas_src>

<mosaic_0001>
module attributes {stable_mosaic.version = 11 : i64} {
  func.func @_mlp_kernel(%arg0: i32, %arg1: memref<256x6xf32, #tpu.memory_space<vmem>>, %arg2: memref<32x6xf32, #tpu.memory_space<vmem>>, %arg3: memref<32x1xf32, #tpu.memory_space<vmem>>, %arg4: memref<4x32xf32, #tpu.memory_space<vmem>>, %arg5: memref<4x1xf32, #tpu.memory_space<vmem>>, %arg6: memref<4x256xf32, #tpu.memory_space<vmem>>) attributes {dimension_semantics = [#tpu.dimension_semantics<parallel>], iteration_bounds = array<i64: 2>, scalar_prefetch = 0 : i64, scratch_operands = 0 : i64, tpu.core_type = #tpu.core_type<tc>, window_params = [{transform_indices = @transform_0, window_bounds = array<i64: 256, 6>}, {pipeline_mode = #tpu.pipeline_mode<synchronous>, transform_indices = @transform_1, window_bounds = array<i64: 32, 6>}, {pipeline_mode = #tpu.pipeline_mode<synchronous>, transform_indices = @transform_2, window_bounds = array<i64: 32, 1>}, {pipeline_mode = #tpu.pipeline_mode<synchronous>, transform_indices = @transform_3, window_bounds = array<i64: 4, 32>}, {pipeline_mode = #tpu.pipeline_mode<synchronous>, transform_indices = @transform_4, window_bounds = array<i64: 4, 1>}, {transform_indices = @transform_5, window_bounds = array<i64: 4, 256>}]} {
    %c0 = arith.constant 0 : index
    %c0_0 = arith.constant 0 : index
    %0 = vector.load %arg1[%c0, %c0_0] : memref<256x6xf32, #tpu.memory_space<vmem>>, vector<256x6xf32>
    %c0_1 = arith.constant 0 : index
    %c0_2 = arith.constant 0 : index
    %1 = vector.load %arg2[%c0_1, %c0_2] : memref<32x6xf32, #tpu.memory_space<vmem>>, vector<32x6xf32>
    %c0_3 = arith.constant 0 : index
    %c0_4 = arith.constant 0 : index
    %2 = vector.load %arg4[%c0_3, %c0_4] : memref<4x32xf32, #tpu.memory_space<vmem>>, vector<4x32xf32>
    %cst = arith.constant dense<0.000000e+00> : vector<32x256xf32>
    %3 = tpu.matmul %1, %0, %cst {dimension_numbers = #tpu.dot_dimension_numbers<[1], [1], [0], [0], [0, 0, 1, 0], [], []>, precision = #tpu.contract_precision<fp32>} : vector<32x6xf32>, vector<256x6xf32>, vector<32x256xf32> -> vector<32x256xf32>
    %c0_5 = arith.constant 0 : index
    %c0_6 = arith.constant 0 : index
    %4 = vector.load %arg3[%c0_5, %c0_6] : memref<32x1xf32, #tpu.memory_space<vmem>>, vector<32x1xf32>
    %5 = vector.broadcast %4 : vector<32x1xf32> to vector<32x256xf32>
    %6 = arith.addf %3, %5 : vector<32x256xf32>
    %cst_7 = arith.constant 0.000000e+00 : f32
    %7 = vector.broadcast %cst_7 : f32 to vector<32x256xf32>
    %8 = arith.maximumf %6, %7 : vector<32x256xf32>
    %cst_8 = arith.constant dense<0.000000e+00> : vector<4x256xf32>
    %9 = tpu.matmul %2, %8, %cst_8 {dimension_numbers = #tpu.dot_dimension_numbers<[1], [0], [0], [1], [0, 0, 1, 1], [], []>, precision = #tpu.contract_precision<fp32>} : vector<4x32xf32>, vector<32x256xf32>, vector<4x256xf32> -> vector<4x256xf32>
    %c0_9 = arith.constant 0 : index
    %c0_10 = arith.constant 0 : index
    %10 = vector.load %arg5[%c0_9, %c0_10] : memref<4x1xf32, #tpu.memory_space<vmem>>, vector<4x1xf32>
    %11 = vector.broadcast %10 : vector<4x1xf32> to vector<4x256xf32>
    %12 = arith.addf %9, %11 : vector<4x256xf32>
    %c0_11 = arith.constant 0 : index
    %c0_12 = arith.constant 0 : index
    %13 = vector.load %arg6[%c0_11, %c0_12] : memref<4x256xf32, #tpu.memory_space<vmem>>, vector<4x256xf32>
    tpu.vector_store %arg6[%c0_11, %c0_12], %12 {strides = array<i32>} : memref<4x256xf32, #tpu.memory_space<vmem>>, vector<4x256xf32>,
    return
  }
  func.func @transform_0(%arg0: i32) -> (i32, i32) {
    %c0_i32 = arith.constant 0 : i32
    %c0_i32_0 = arith.constant 0 : i32
    return %arg0, %c0_i32 : i32, i32
  }
  func.func @transform_1(%arg0: i32) -> (i32, i32) {
    %c0_i32 = arith.constant 0 : i32
    %c0_i32_0 = arith.constant 0 : i32
    %c0_i32_1 = arith.constant 0 : i32
    return %c0_i32, %c0_i32_0 : i32, i32
  }
  func.func @transform_2(%arg0: i32) -> (i32, i32) {
    %c0_i32 = arith.constant 0 : i32
    %c0_i32_0 = arith.constant 0 : i32
    %c0_i32_1 = arith.constant 0 : i32
    return %c0_i32, %c0_i32_0 : i32, i32
  }
  func.func @transform_3(%arg0: i32) -> (i32, i32) {
    %c0_i32 = arith.constant 0 : i32
    %c0_i32_0 = arith.constant 0 : i32
    %c0_i32_1 = arith.constant 0 : i32
    return %c0_i32, %c0_i32_0 : i32, i32
  }
  func.func @transform_4(%arg0: i32) -> (i32, i32) {
    %c0_i32 = arith.constant 0 : i32
    %c0_i32_0 = arith.constant 0 : i32
    %c0_i32_1 = arith.constant 0 : i32
    return %c0_i32, %c0_i32_0 : i32, i32
  }
  func.func @transform_5(%arg0: i32) -> (i32, i32) {
    %c0_i32 = arith.constant 0 : i32
    %c0_i32_0 = arith.constant 0 : i32
    return %c0_i32, %arg0 : i32, i32
  }
}

</mosaic_0001>

<bundles_post_ra>
// kernel: simple_relu_nn_forward.1
= control target key start
LH: loop header
LB: loop body
LE: loop exit
PB: predicated region body
PF: predicated region fallthrough
CT: control target
= control target key end

     0   :  { %s1779_s18 = smov 0   ;;  %s2525_s0 = inlined_call_operand.vmem [shape: f32[512,6], index: 0, kind: input, shape index: {}]   ;;  %s2526_s1 = inlined_call_operand.vmem [shape: f32[32,6], index: 1, kind: input, shape index: {}]   ;;  %s2527_s2 = inlined_call_operand.vmem [shape: f32[32,1], index: 2, kind: input, shape index: {}]   ;;  %s2528_s3 = inlined_call_operand.vmem [shape: f32[4,32], index: 3, kind: input, shape index: {}]   ;;  %s2529_s4 = inlined_call_operand.vmem [shape: f32[4,1], index: 4, kind: input, shape index: {}]   ;;  %s2530_s5 = inlined_call_operand.vmem [shape: f32[4,512], index: 5, kind: output, shape index: {}]  }
   0x1 LB: > { %s1717_s19 = sadd.s32 4294967295, %s1746_s18   ;;  %p1721_p0 = scmp.ge.s32.totalorder %s1746_s18, 1  ;;  %s1746_s18 = sphi %s1779_s18, %s15_s18  }
   0x2   : > { %p188_p1 = scmp.lt.s32.totalorder %s1746_s18, 3 }
   0x4   : > { %p189_p2 = pnand %p1721_p0, %p188_p1 }
   0x6   : > { %192 = sbr.rel (%p189_p2) target bundleno = 542 (0x21e), region = 40 }
   0xb   : > { %s1722_s20 = sshll.u32 %s1717_s19, 5  ;;  %vm289_vm0 = vcmask 48128   ;;  %vm1280_vm1 = vcmask 261120   ;;  %s1724_s22 = sshll.u32 %s1717_s19, 1  ;;  %vm1657_vm2 = vcmask 1043456  }
   0xc   : > { %p217_p3 = scmp.lt.s32.totalorder %s1722_s20, 63  ;;  %p223_p4 = scmp.lt.s32.totalorder %s1724_s22, 3 }
   0xe   : > { %s2606_s20 = smov (!%p217_p3, %s1722_s20), 63  ;;  %s2608_s22 = smov (!%p223_p4, %s1724_s22), 3 }
   0xf   : > { %s1723_s21 = sshll.u32 %s2606_s20, 3  ;;  %s1725_s23 = sshll.u32 %s2608_s22, 2 }
  0x10   : > { %s1792_s24 = scalar_lea.vmem %s2525_s0, %s1723_s21  ;;  %s226_s25 = scalar_lea.vmem %s2530_s5, %s1725_s23 }
  0x11   : > { %v243_v0 = vld [vmem:[%s1792_s24 + $0x78] sm:$0xff]  ;;  %v242_v1 = vld [vmem:[%s1792_s24 + $0x70] sm:$0xff]  ;;  %v241_v2 = vld [vmem:[%s1792_s24 + $0x68] sm:$0xff] }
  0x12   : > { %v348_v3 = vsel %vm289_vm0, %v243_v0, 0  ;;  %v345_v4 = vsel %vm289_vm0, %v242_v1, 0  ;;  %v342_v5 = vsel %vm289_vm0, %v241_v2, 0  ;;  %v240_v6 = vld [vmem:[%s1792_s24 + $0x60] sm:$0xff]  ;;  %v239_v7 = vld [vmem:[%s1792_s24 + $0x58] sm:$0xff]  ;;  %v238_v17 = vld [vmem:[%s1792_s24 + $0x50] sm:$0xff] }
  0x13   : > { %v1802_v8 = vand.u32 4294901760, %v348_v3  ;;  %v1804_v9 = vand.u32 4294901760, %v345_v4  ;;  %v1806_v10 = vand.u32 4294901760, %v342_v5  ;;  %v339_v11 = vsel %vm289_vm0, %v240_v6, 0  ;;  %v237_v26 = vld [vmem:[%s1792_s24 + $0x48] sm:$0xff]  ;;  %v236_v34 = vld [vmem:[%s1792_s24 + $0x40] sm:$0xff] }
  0x14   : > { %v1809_v12 = vand.u32 4294901760, %v339_v11  ;;  %v336_v16 = vsel %vm289_vm0, %v239_v7, 0  ;;  %v333_v21 = vsel %vm289_vm0, %v238_v17, 0  ;;  %v330_v29 = vsel %vm289_vm0, %v237_v26, 0  ;;  %v235_v41 = vld [vmem:[%s1792_s24 + $0x38] sm:$0xff]  ;;  %v234_v48 = vld [vmem:[%s1792_s24 + $0x30] sm:$0xff] }
  0x15   : > { %399 = vmatpush.xpose.msra.mxu0 %v1802_v8  ;;  %v1813_v13 = vsub.f32 %v348_v3, %v1802_v8  ;;  %646 = vmatpush.xpose.msra.mxu3 %v1802_v8  ;;  %v1817_v14 = vsub.f32 %v345_v4, %v1804_v9  ;;  %v1820_v15 = vsub.f32 %v342_v5, %v1806_v10  ;;  %v1827_v20 = vand.u32 4294901760, %v336_v16  ;;  %v233_v54 = vld [vmem:[%s1792_s24 + $0x28] sm:$0xff]  ;;  %v232_v62 = vld [vmem:[%s1792_s24 + $0x20] sm:$0xff]  ;;  %v231_v5 = vld [vmem:[%s1792_s24 + $0x18] sm:$0xff] }
  0x16   : > { %v1840_v25 = vsub.f32 %v339_v11, %v1809_v12  ;;  %v1844_v28 = vand.u32 4294901760, %v333_v21  ;;  %v1858_v35 = vand.u32 4294901760, %v330_v29  ;;  %v327_v40 = vsel %vm289_vm0, %v236_v34, 0 }
  0x17   : > { %578 = vmatpush.xpose.msra.mxu2 %v1813_v13  ;;  %v465_v18 = vand.u32 4294901760, %v1813_v13  ;;  %v471_v19 = vand.u32 4294901760, %v1817_v14  ;;  %v477_v24 = vand.u32 4294901760, %v1820_v15  ;;  %v1853_v33 = vsub.f32 %v336_v16, %v1827_v20 }
  0x18   : > { %v2546_v32 = vand.u32 4294901760, %v1840_v25  ;;  %v1866_v39 = vsub.f32 %v333_v21, %v1844_v28  ;;  %v1873_v42 = vsub.f32 %v330_v29, %v1858_v35  ;;  %v1879_v45 = vand.u32 4294901760, %v327_v40 }
  0x19   : > { %401 = vmatpush.xpose.msra.mxu0 %v1804_v9  ;;  %v466_v22 = vsub.f32 %v1813_v13, %v465_v18  ;;  %648 = vmatpush.xpose.msra.mxu3 %v1804_v9  ;;  %v472_v23 = vsub.f32 %v1817_v14, %v471_v19  ;;  %v478_v31 = vsub.f32 %v1820_v15, %v477_v24  ;;  %v2545_v38 = vand.u32 4294901760, %v1853_v33 }
  0x1a   : > { %v484_v37 = vsub.f32 %v1840_v25, %v2546_v32  ;;  %v2544_v46 = vand.u32 4294901760, %v1866_v39  ;;  %v324_v47 = vsel %vm289_vm0, %v235_v41, 0  ;;  %v2541_v49 = vand.u32 4294901760, %v1873_v42  ;;  %v258_v41 = vld [vmem:[%s1792_s24 + $0xf0] sm:$0xff] }
  0x1b   : > { %v467_v27 = vand.u32 4294901760, %v466_v22  ;;  %581 = vmatpush.xpose.msra.mxu2 %v1817_v14  ;;  %v473_v30 = vand.u32 4294901760, %v472_v23  ;;  %v479_v36 = vand.u32 4294901760, %v478_v31  ;;  %v490_v44 = vsub.f32 %v1853_v33, %v2545_v38  ;;  %v230_v22 = vld [vmem:[%s1792_s24 + $0x10] sm:$0xff]  ;;  %v259_v31 = vld [vmem:[%s1792_s24 + $0xf8] sm:$0xff] }
  0x1c   : > { %v485_v43 = vand.u32 4294901760, %v484_v37  ;;  %v496_v51 = vsub.f32 %v1866_v39, %v2544_v46  ;;  %v1891_v52 = vand.u32 4294901760, %v324_v47  ;;  %v1894_v53 = vsub.f32 %v327_v40, %v1879_v45 }
  0x1d   : > { %403 = vmatpush.xpose.msra.mxu0 %v1806_v10  ;;  %468 = vmatpush.xpose.msra.mxu1 %v467_v27  ;;  %v491_v50 = vand.u32 4294901760, %v490_v44  ;;  %v321_v55 = vsel %vm289_vm0, %v234_v48, 0  ;;  %v502_v56 = vsub.f32 %v1873_v42, %v2541_v49  ;;  %v318_v57 = vsel %vm289_vm0, %v233_v54, 0 }
  0x1e   : > { %650 = vmatpush.xpose.msra.mxu3 %v1806_v10  ;;  %v497_v58 = vand.u32 4294901760, %v496_v51  ;;  %v1905_v59 = vand.u32 4294901760, %v321_v55  ;;  %v2539_v60 = vand.u32 4294901760, %v1894_v53  ;;  %v1909_v61 = vsub.f32 %v324_v47, %v1891_v52  ;;  %v228_v51 = vld [vmem:[%s1792_s24] sm:$0xff] }
  0x1f   : > { %584 = vmatpush.xpose.msra.mxu2 %v1820_v15  ;;  %v503_v63 = vand.u32 4294901760, %v502_v56  ;;  %v1914_v0 = vand.u32 4294901760, %v318_v57  ;;  %v315_v4 = vsel %vm289_vm0, %v232_v62, 0  ;;  %v312_v21 = vsel %vm289_vm0, %v231_v5, 0 }
  0x20   : > { %v508_v1 = vsub.f32 %v1894_v53, %v2539_v60  ;;  %v2538_v2 = vand.u32 4294901760, %v1909_v61  ;;  %v1922_v3 = vsub.f32 %v321_v55, %v1905_v59  ;;  %v1928_v6 = vand.u32 4294901760, %v315_v4  ;;  %v253_v60 = vld [vmem:[%s1792_s24 + $0xc8] sm:$0xff] }
  0x21   : > { %405 = vmatpush.xpose.msra.mxu0 %v1809_v12  ;;  %474 = vmatpush.xpose.msra.mxu1 %v473_v30  ;;  %v1936_v17 = vsub.f32 %v318_v57, %v1914_v0  ;;  %v1949_v29 = vand.u32 4294901760, %v312_v21  ;;  %v309_v34 = vsel %vm289_vm0, %v230_v22, 0  ;;  %v396_v40 = vsel %vm289_vm0, %v259_v31, 0  ;;  %v257_v57 = vld [vmem:[%s1792_s24 + $0xe8] sm:$0xff]  ;;  %v256_v22 = vld [vmem:[%s1792_s24 + $0xe0] sm:$0xff] }
  0x22   : > { %652 = vmatpush.xpose.msra.mxu3 %v1809_v12  ;;  %v509_v7 = vand.u32 4294901760, %v508_v1  ;;  %v514_v11 = vsub.f32 %v1909_v61, %v2538_v2  ;;  %v2537_v16 = vand.u32 4294901760, %v1922_v3  ;;  %v1943_v23 = vsub.f32 %v315_v4, %v1928_v6 }
  0x23   : > { %587 = vmatpush.xpose.msra.mxu2 %v1840_v25  ;;  %v2535_v30 = vand.u32 4294901760, %v1936_v17  ;;  %v1964_v47 = vand.u32 4294901760, %v309_v34  ;;  %v1967_v48 = vsub.f32 %v312_v21, %v1949_v29  ;;  %v1973_v54 = vand.u32 4294901760, %v396_v40 }
  0x24   : > { %v515_v26 = vand.u32 4294901760, %v514_v11  ;;  %v520_v27 = vsub.f32 %v1922_v3, %v2537_v16  ;;  %v2533_v37 = vand.u32 4294901760, %v1943_v23  ;;  %v393_v55 = vsel %vm289_vm0, %v258_v41, 0 }
  0x25   : > { %407 = vmatpush.xpose.msra.mxu0 %v1827_v20  ;;  %480 = vmatpush.xpose.msra.mxu1 %v479_v36  ;;  %v229_v36 = vld [vmem:[%s1792_s24 + $0x8] sm:$0xff]  ;;  %v526_v44 = vsub.f32 %v1936_v17, %v2535_v30  ;;  %v1985_v1 = vsub.f32 %v309_v34, %v1964_v47  ;;  %v303_v4 = vsel %vm289_vm0, %v228_v51, 0  ;;  %v1989_v5 = vand.u32 4294901760, %v393_v55 }
  0x26   : > { %654 = vmatpush.xpose.msra.mxu3 %v1827_v20  ;;  %v532_v56 = vsub.f32 %v1943_v23, %v2533_v37  ;;  %v390_v11 = vsel %vm289_vm0, %v257_v57, 0  ;;  %v378_v13 = vsel %vm289_vm0, %v253_v60, 0 }
  0x27   : > { %590 = vmatpush.xpose.msra.mxu2 %v1853_v33  ;;  %v2531_v31 = vand.u32 4294901760, %v1985_v1  ;;  %v2104_v32 = vand.u32 4294901760, %v378_v13 }
  0x28   : > { %v533_v21 = vand.u32 4294901760, %v532_v56  ;;  %v255_v56 = vld [vmem:[%s1792_s24 + $0xd8] sm:$0xff] }
  0x29   : > { %409 = vmatpush.xpose.msra.mxu0 %v1844_v28  ;;  %486 = vmatpush.xpose.msra.mxu1 %v485_v43  ;;  %v521_v43 = vand.u32 4294901760, %v520_v27  ;;  %v2001_v27 = vand.u32 4294901760, %v303_v4 }
  0x2a   : > { %656 = vmatpush.xpose.msra.mxu3 %v1844_v28 }
  0x2b   : > { %593 = vmatpush.xpose.msra.mxu2 %v1866_v39 }
  0x2d   : > { %411 = vmatpush.xpose.msra.mxu0 %v1858_v35  ;;  %492 = vmatpush.xpose.msra.mxu1 %v491_v50  ;;  %v306_v50 = vsel %vm289_vm0, %v229_v36, 0  ;;  %v2009_v36 = vsub.f32 %v393_v55, %v1989_v5  ;;  %v2022_v55 = vsub.f32 %v303_v4, %v2001_v27  ;;  %v260_v4 = vld [vmem:[%s2526_s1] sm:$0xff] }
  0x2e   : > { %658 = vmatpush.xpose.msra.mxu3 %v1858_v35  ;;  %v1981_v62 = vand.u32 4294901760, %v306_v50 }
  0x2f   : > { %596 = vmatpush.xpose.msra.mxu2 %v1873_v42  ;;  %v2540_v57 = vand.u32 4294901760, %v2009_v36  ;;  %v2543_v37 = vand.u32 4294901760, %v2022_v55 }
  0x30   : > { %v2005_v34 = vsub.f32 %v306_v50, %v1981_v62  ;;  %v544_v50 = vsub.f32 %v1985_v1, %v2531_v31  ;;  %v291_v31 = vsel %vm289_vm0, %v260_v4, 0 }
  0x31   : > { %413 = vmatpush.xpose.msra.mxu0 %v1879_v45  ;;  %498 = vmatpush.xpose.msra.mxu1 %v497_v58  ;;  %v527_v58 = vand.u32 4294901760, %v526_v44  ;;  %v2047_v30 = vand.u32 4294901760, %v291_v31 }
  0x32   : > { %660 = vmatpush.xpose.msra.mxu3 %v1879_v45  ;;  %v2536_v51 = vand.u32 4294901760, %v2005_v34 }
  0x33   : > { %599 = vmatpush.xpose.msra.mxu2 %v1894_v53  ;;  %v2061_v16 = vsub.f32 %v291_v31, %v2047_v30 }
  0x35   : > { %415 = vmatpush.xpose.msra.mxu0 %v1891_v52  ;;  %504 = vmatpush.xpose.msra.mxu1 %v503_v63  ;;  %v2532_v63 = vand.u32 4294901760, %v1967_v48  ;;  %2562 = vst [vmem:[#allocation2_spill] sm:$0xff] %v2061_v16  ;;  %v2070_v49 = vand.u32 4294901760, %v2061_v16 }
  0x36   : > { %662 = vmatpush.xpose.msra.mxu3 %v1891_v52 }
  0x37   : > { %602 = vmatpush.xpose.msra.mxu2 %v1909_v61  ;;  %2563 = vst [vmem:[#allocation3_spill] sm:$0xff] %v2070_v49 }
  0x39   : > { %417 = vmatpush.xpose.msra.mxu0 %v1905_v59  ;;  %510 = vmatpush.xpose.msra.mxu1 %v509_v7  ;;  %v1993_v7 = vsub.f32 %v396_v40, %v1973_v54  ;;  %v2011_v40 = vand.u32 4294901760, %v390_v11 }
  0x3a   : > { %664 = vmatpush.xpose.msra.mxu3 %v1905_v59 }
  0x3b   : > { %605 = vmatpush.xpose.msra.mxu2 %v1922_v3  ;;  %v2534_v41 = vand.u32 4294901760, %v1993_v7 }
  0x3d   : > { %419 = vmatpush.xpose.msra.mxu0 %v1914_v0  ;;  %516 = vmatpush.xpose.msra.mxu1 %v515_v26  ;;  %v538_v26 = vsub.f32 %v1967_v48, %v2532_v63  ;;  %v550_v63 = vsub.f32 %v2005_v34, %v2536_v51 }
  0x3e   : > { %666 = vmatpush.xpose.msra.mxu3 %v1914_v0 }
  0x3f   : > { %608 = vmatpush.xpose.msra.mxu2 %v1936_v17  ;;  %v539_v44 = vand.u32 4294901760, %v538_v26  ;;  %v384_v26 = vsel %vm289_vm0, %v255_v56, 0  ;;  %v906_v56 = vsub.f32 %v2009_v36, %v2540_v57  ;;  %v551_v57 = vand.u32 4294901760, %v550_v63 }
  0x40   : > { %v2058_v51 = vand.u32 4294901760, %v384_v26 }
  0x41   : > { %421 = vmatpush.xpose.msra.mxu0 %v1928_v6  ;;  %522 = vmatpush.xpose.msra.mxu1 %v521_v43  ;;  %v387_v43 = vsel %vm289_vm0, %v256_v22, 0  ;;  %v900_v22 = vsub.f32 %v1993_v7, %v2534_v41  ;;  %v254_v41 = vld [vmem:[%s1792_s24 + $0xd0] sm:$0xff]  ;;  %v907_v31 = vand.u32 4294901760, %v906_v56  ;;  %v261_v56 = vld [vmem:[%s2526_s1 + $0x8] sm:$0xff] }
  0x42   : > { %668 = vmatpush.xpose.msra.mxu3 %v1928_v6  ;;  %v381_v2 = vsel %vm289_vm0, %v254_v41, 0 }
  0x43   : > { %611 = vmatpush.xpose.msra.mxu2 %v1943_v23 }
  0x45   : > { %423 = vmatpush.xpose.msra.mxu0 %v1949_v29  ;;  %528 = vmatpush.xpose.msra.mxu1 %v527_v58  ;;  %v2028_v58 = vsub.f32 %v390_v11, %v2011_v40  ;;  %v545_v11 = vand.u32 4294901760, %v544_v50  ;;  %v901_v50 = vand.u32 4294901760, %v900_v22  ;;  %v2081_v22 = vsub.f32 %v384_v26, %v2058_v51 }
  0x46   : > { %670 = vmatpush.xpose.msra.mxu3 %v1949_v29 }
  0x47   : > { %614 = vmatpush.xpose.msra.mxu2 %v1967_v48  ;;  %v2542_v4 = vand.u32 4294901760, %v2028_v58 }
  0x49   : > { %425 = vmatpush.xpose.msra.mxu0 %v1964_v47  ;;  %534 = vmatpush.xpose.msra.mxu1 %v533_v21  ;;  %v2030_v21 = vand.u32 4294901760, %v387_v43  ;;  %v912_v41 = vsub.f32 %v2028_v58, %v2542_v4  ;;  %v252_v4 = vld [vmem:[%s1792_s24 + $0xc0] sm:$0xff] }
  0x4a   : > { %672 = vmatpush.xpose.msra.mxu3 %v1964_v47 }
  0x4b   : > { %617 = vmatpush.xpose.msra.mxu2 %v1985_v1  ;;  %v913_v60 = vand.u32 4294901760, %v912_v41 }
  0x4d   : > { %427 = vmatpush.xpose.msra.mxu0 %v1981_v62  ;;  %540 = vmatpush.xpose.msra.mxu1 %v539_v44  ;;  %v2055_v44 = vsub.f32 %v387_v43, %v2030_v21  ;;  %v556_v43 = vsub.f32 %v2022_v55, %v2543_v37  ;;  %v294_v37 = vsel %vm289_vm0, %v261_v56, 0 }
  0x4e   : > { %674 = vmatpush.xpose.msra.mxu3 %v1981_v62  ;;  %v2096_v46 = vand.u32 4294901760, %v294_v37 }
  0x4f   : > { %620 = vmatpush.xpose.msra.mxu2 %v2005_v34  ;;  %v2548_v63 = vand.u32 4294901760, %v2055_v44 }
  0x50   : > { %v2114_v14 = vsub.f32 %v294_v37, %v2096_v46 }
  0x51   : > { %429 = vmatpush.xpose.msra.mxu0 %v2001_v27  ;;  %546 = vmatpush.xpose.msra.mxu1 %v545_v11  ;;  %v2083_v11 = vand.u32 4294901760, %v381_v2  ;;  %v918_v38 = vsub.f32 %v2055_v44, %v2548_v63 }
  0x52   : > { %676 = vmatpush.xpose.msra.mxu3 %v2001_v27  ;;  %2564 = vst [vmem:[#allocation4_spill] sm:$0xff] %v2114_v14  ;;  %v2119_v41 = vand.u32 4294901760, %v2114_v14 }
  0x53   : > { %623 = vmatpush.xpose.msra.mxu2 %v2022_v55 }
  0x54   : > { %2565 = vst [vmem:[#allocation5_spill] sm:$0xff] %v2119_v41  ;;  %v441_v15 = vsub.f32 %v2114_v14, %v2119_v41 }
  0x55   : > { %705 = vmatpush.xpose.msrb.mxu0 %v465_v18  ;;  %v433_v18 = vsub.f32 %v2061_v16, %v2070_v49  ;;  %552 = vmatpush.xpose.msra.mxu1 %v551_v57  ;;  %v2547_v57 = vand.u32 4294901760, %v2081_v22 }
  0x56   : > { %902 = vmatpush.xpose.msrb.mxu3 %v901_v50  ;;  %v557_v50 = vand.u32 4294901760, %v556_v43  ;;  %626 = vmatmul.f32.vlgmr.msra.gmra.mxu2 %v2061_v16  ;;  %v2109_v43 = vsub.f32 %v381_v2, %v2083_v11  ;;  %v919_v2 = vand.u32 4294901760, %v918_v38  ;;  %v250_v38 = vld [vmem:[%s1792_s24 + $0xb0] sm:$0xff] }
  0x57   : > { %833 = vmatpush.xpose.msrb.mxu2 %v1973_v54  ;;  %v2094_v26 = vand.u32 4294901760, %v433_v18  ;;  %680 = vmatmul.f32.vlgmr.msra.gmra.mxu3 %v2070_v49  ;;  %v375_v18 = vsel %vm289_vm0, %v252_v4, 0  ;;  %v2125_v4 = vsub.f32 %v378_v13, %v2104_v32  ;;  %v924_v37 = vsub.f32 %v2081_v22, %v2547_v57 }
  0x58   : > { %v2143_v13 = vand.u32 4294901760, %v441_v15  ;;  %v2568_v15 = vand.u32 4294901760, %v2109_v43 }
  0x59   : > { %709 = vmatpush.xpose.msrb.mxu0 %v471_v19  ;;  %v251_v19 = vld [vmem:[%s1792_s24 + $0xb8] sm:$0xff]  ;;  %558 = vmatpush.xpose.msra.mxu1 %v557_v50  ;;  %2566 = vst [vmem:[#allocation6_spill] sm:$0xff] %v2125_v4  ;;  %v2552_v57 = vand.u32 4294901760, %v2125_v4 }
  0x5a   : > { %908 = vmatpush.xpose.msrb.mxu3 %v907_v31  ;;  %435 = vmatmul.f32.vlgmr.msra.gmra.mxu0 %v2094_v26  ;;  %v2127_v31 = vand.u32 4294901760, %v375_v18  ;;  %v372_v50 = vsel %vm289_vm0, %v251_v19, 0  ;;  %v2567_v19 = vand.u32 4294901760, %v1840_v25  ;;  %v930_v49 = vsub.f32 %v2109_v43, %v2568_v15 }
  0x5b   : > { %835 = vmatpush.xpose.msrb.mxu2 %v1989_v5  ;;  %v2155_v56 = vand.u32 4294901760, %v372_v50 }
  0x5c   : > { %560 = vmatmul.f32.vlgmr.msra.gmra.mxu1 %v2047_v30  ;;  %v2153_v63 = vsub.f32 %v375_v18, %v2127_v31  ;;  %v931_v15 = vand.u32 4294901760, %v930_v49 }
  0x5d   : > { %713 = vmatpush.xpose.msrb.mxu0 %v477_v24  ;;  %784 = vmatpush.xpose.msrb.mxu1 %v1802_v8  ;;  %v262_v8 = vld [vmem:[%s2526_s1 + $0x10] sm:$0xff] }
  0x5e   : > { %914 = vmatpush.xpose.msrb.mxu3 %v913_v60  ;;  %v297_v24 = vsel %vm289_vm0, %v262_v8, 0  ;;  %v925_v8 = vand.u32 4294901760, %v924_v37  ;;  %631 = vmatmul.f32.gmra.mxu2 %v2114_v14  ;;  %v936_v37 = vsub.f32 %v2125_v4, %v2552_v57  ;;  %v2572_v57 = vand.u32 4294901760, %v1866_v39 }
  0x5f   : > { %837 = vmatpush.xpose.msrb.mxu2 %v2011_v40  ;;  %v2145_v60 = vand.u32 4294901760, %v297_v24  ;;  %686 = vmatmul.f32.gmra.mxu3 %v2119_v41 }
  0x61   : > { %717 = vmatpush.xpose.msrb.mxu0 %v2567_v19  ;;  %786 = vmatpush.xpose.msrb.mxu1 %v1804_v9  ;;  %v2162_v25 = vsub.f32 %v297_v24, %v2145_v60  ;;  %v369_v9 = vsel %vm289_vm0, %v250_v38, 0  ;;  %v249_v19 = vld [vmem:[%s1792_s24 + $0xa8] sm:$0xff]  ;;  %v2179_v38 = vsub.f32 %v372_v50, %v2155_v56  ;;  %v937_v24 = vand.u32 4294901760, %v936_v37 }
  0x62   : > { %920 = vmatpush.xpose.msrb.mxu3 %v919_v2  ;;  %443 = vmatmul.f32.gmra.mxu0 %v2143_v13  ;;  %v2571_v2 = vand.u32 4294901760, %v1853_v33  ;;  %v2181_v41 = vand.u32 4294901760, %v369_v9  ;;  %v366_v33 = vsel %vm289_vm0, %v249_v19, 0  ;;  %v2573_v19 = vand.u32 4294901760, %v2153_v63 }
  0x63   : > { %2569 = vst [vmem:[#allocation7_spill] sm:$0xff] %v2162_v25  ;;  %839 = vmatpush.xpose.msrb.mxu2 %v2030_v21  ;;  %v2168_v18 = vand.u32 4294901760, %v2162_v25  ;;  %v2558_v4 = vand.u32 4294901760, %v2179_v38 }
  0x64   : > { %564 = vmatmul.f32.gmra.mxu1 %v2096_v46  ;;  %v942_v16 = vsub.f32 %v2153_v63, %v2573_v19 }
  0x65   : > { %2570 = vst [vmem:[#allocation8_spill] sm:$0xff] %v2168_v18  ;;  %721 = vmatpush.xpose.msrb.mxu0 %v2571_v2  ;;  %788 = vmatpush.xpose.msrb.mxu1 %v1806_v10  ;;  %v449_v14 = vsub.f32 %v2162_v25, %v2168_v18  ;;  %v263_v10 = vld [vmem:[%s2526_s1 + $0x18] sm:$0xff]  ;;  %v248_v2 = vld [vmem:[%s1792_s24 + $0xa0] sm:$0xff]  ;;  %v948_v37 = vsub.f32 %v2179_v38, %v2558_v4 }
  0x66   : > { %926 = vmatpush.xpose.msrb.mxu3 %v925_v8  ;;  %v300_v50 = vsel %vm289_vm0, %v263_v10, 0  ;;  %v2208_v10 = vand.u32 4294901760, %v366_v33  ;;  %636 = vmatmul.f32.gmra.mxu2 %v2162_v25 }
  0x67   : > { %841 = vmatpush.xpose.msrb.mxu2 %v2058_v51  ;;  %v2193_v49 = vand.u32 4294901760, %v449_v14  ;;  %v2195_v8 = vand.u32 4294901760, %v300_v50  ;;  %692 = vmatmul.f32.gmra.mxu3 %v2168_v18  ;;  %v2206_v14 = vsub.f32 %v369_v9, %v2181_v41  ;;  %v363_v18 = vsel %vm289_vm0, %v248_v2, 0 }
  0x68   : > { %v2576_v9 = vand.u32 4294901760, %v1873_v42  ;;  %v943_v2 = vand.u32 4294901760, %v942_v16  ;;  %v2231_v19 = vsub.f32 %v366_v33, %v2208_v10  ;;  %v246_v42 = vld [vmem:[%s1792_s24 + $0x90] sm:$0xff]  ;;  %v2577_v16 = vand.u32 4294901760, %v1894_v53 }
  0x69   : > { %725 = vmatpush.xpose.msrb.mxu0 %v2572_v57  ;;  %790 = vmatpush.xpose.msrb.mxu1 %v1809_v12  ;;  %v2213_v39 = vsub.f32 %v300_v50, %v2195_v8  ;;  %v247_v12 = vld [vmem:[%s1792_s24 + $0x98] sm:$0xff]  ;;  %v2559_v50 = vand.u32 4294901760, %v2206_v14  ;;  %v357_v53 = vsel %vm289_vm0, %v246_v42, 0 }
  0x6a   : > { %932 = vmatpush.xpose.msrb.mxu3 %v931_v15  ;;  %451 = vmatmul.f32.gmra.mxu0 %v2193_v49  ;;  %v2227_v15 = vand.u32 4294901760, %v363_v18  ;;  %v959_v4 = vand.u32 4294901760, %v2231_v19 }
  0x6b   : > { %2574 = vst [vmem:[#allocation9_spill] sm:$0xff] %v2213_v39  ;;  %843 = vmatpush.xpose.msrb.mxu2 %v2083_v11  ;;  %v2218_v57 = vand.u32 4294901760, %v2213_v39 }
  0x6c   : > { %568 = vmatmul.f32.gmra.mxu1 %v2145_v60  ;;  %v2246_v33 = vsub.f32 %v363_v18, %v2227_v15  ;;  %v2578_v18 = vand.u32 4294901760, %v1909_v61  ;;  %v244_v61 = vld [vmem:[%s1792_s24 + $0x80] sm:$0xff] }
  0x6d   : > { %2575 = vst [vmem:[#allocation10_spill] sm:$0xff] %v2218_v57  ;;  %729 = vmatpush.xpose.msrb.mxu0 %v2576_v9  ;;  %792 = vmatpush.xpose.msrb.mxu1 %v1827_v20  ;;  %v457_v25 = vsub.f32 %v2213_v39, %v2218_v57  ;;  %v360_v20 = vsel %vm289_vm0, %v247_v12, 0  ;;  %v954_v12 = vsub.f32 %v2206_v14, %v2559_v50 }
  0x6e   : > { %938 = vmatpush.xpose.msrb.mxu3 %v937_v24  ;;  %v949_v24 = vand.u32 4294901760, %v948_v37  ;;  %v245_v37 = vld [vmem:[%s1792_s24 + $0x88] sm:$0xff]  ;;  %641 = vmatmul.f32.gmra.mxu2 %v2213_v39  ;;  %v960_v50 = vsub.f32 %v2231_v19, %v959_v4  ;;  %v2272_v39 = vand.u32 4294901760, %v357_v53 }
  0x6f   : > { %845 = vmatpush.xpose.msrb.mxu2 %v2104_v32  ;;  %v2239_v9 = vand.u32 4294901760, %v457_v25  ;;  %698 = vmatmul.f32.gmra.mxu3 %v2218_v57  ;;  %v2252_v25 = vand.u32 4294901760, %v360_v20  ;;  %v955_v42 = vand.u32 4294901760, %v954_v12 }
  0x70   : > { %v961_v12 = vand.u32 4294901760, %v960_v50 }
  0x71   : > { %733 = vmatpush.xpose.msrb.mxu0 %v2577_v16  ;;  %794 = vmatpush.xpose.msrb.mxu1 %v1844_v28  ;;  %v1748_v28 = vmov 0   ;;  %v266_v16 = vld [vmem:[%s2527_s2 + $0x8] sm:$0xff]  ;;  %v2270_v57 = vsub.f32 %v360_v20, %v2252_v25 }
  0x72   : > { %944 = vmatpush.xpose.msrb.mxu3 %v943_v2  ;;  %459 = vmatmul.f32.gmra.mxu0 %v2239_v9  ;;  %v965_v2 = vand.u32 4294901760, %v2246_v33 }
  0x73   : > { %847 = vmatpush.xpose.msrb.mxu2 %v2127_v31  ;;  %1738 = vset.pattern.permute.xlu1 %v1748_v28 }
  0x74   : > { %1737 = vset.pattern.permute.xlu0 %v1748_v28  ;;  %276 = vperm.xlu1 %1738, %v266_v16   ;;  %v966_v20 = vsub.f32 %v2246_v33, %v965_v2  ;;  %v2286_v16 = vsub.f32 %v357_v53, %v2272_v39 }
  0x75   : > { %737 = vmatpush.xpose.msrb.mxu0 %v2578_v18  ;;  %796 = vmatpush.xpose.msrb.mxu1 %v1858_v35  ;;  %v354_v35 = vsel %vm289_vm0, %v245_v37, 0  ;;  %v971_v18 = vand.u32 4294901760, %v2270_v57 }
  0x76   : > { %950 = vmatpush.xpose.msrb.mxu3 %v949_v24  ;;  %572 = vmatmul.f32.gmra.mxu1 %v2195_v8  ;;  %v2579_v24 = vand.u32 4294901760, %v1922_v3  ;;  %v2288_v37 = vand.u32 4294901760, %v354_v35  ;;  %v351_v3 = vsel %vm289_vm0, %v244_v61, 0  ;;  %v967_v50 = vand.u32 4294901760, %v966_v20 }
  0x77   : > { %849 = vmatpush.xpose.msrb.mxu2 %v2155_v56  ;;  %1739 = vset.pattern.permute.xlu2 %v1748_v28  ;;  %v2580_v28 = vand.u32 4294901760, %v1936_v17  ;;  %v972_v53 = vsub.f32 %v2270_v57, %v971_v18  ;;  %v2305_v61 = vand.u32 4294901760, %v351_v3  ;;  %v2581_v17 = vand.u32 4294901760, %v1943_v23  ;;  %v268_v23 = vld [vmem:[%s2527_s2 + $0x18] sm:$0xff] }
  0x78   : > { %286 = vperm.xlu0 %1737, %v268_v23  }
  0x79   : > { %741 = vmatpush.xpose.msrb.mxu0 %v2579_v24  ;;  %798 = vmatpush.xpose.msrb.mxu1 %v1879_v45  ;;  %v265_v45 = vld [vmem:[%s2527_s2] sm:$0xff]  ;;  %v2303_v24 = vsub.f32 %v354_v35, %v2288_v37  ;;  %v2316_v35 = vsub.f32 %v351_v3, %v2305_v61 }
  0x7a   : > { %956 = vmatpush.xpose.msrb.mxu3 %v955_v42  ;;  %v977_v42 = vand.u32 4294901760, %v2286_v16 }
  0x7b   : > { %851 = vmatpush.xpose.msrb.mxu2 %v2181_v41  ;;  %v989_v3 = vand.u32 4294901760, %v2316_v35 }
  0x7c   : > { %271 = vperm.xlu1 %1738, %v265_v45   ;;  %v978_v20 = vsub.f32 %v2286_v16, %v977_v42  ;;  %v2582_v45 = vand.u32 4294901760, %v1967_v48 }
  0x7d   : > { %745 = vmatpush.xpose.msrb.mxu0 %v2580_v28  ;;  %800 = vmatpush.xpose.msrb.mxu1 %v1891_v52  ;;  %v973_v52 = vand.u32 4294901760, %v972_v53  ;;  %v267_v53 = vld [vmem:[%s2527_s2 + $0x10] sm:$0xff] }
  0x7e   : > { %962 = vmatpush.xpose.msrb.mxu3 %v961_v12  ;;  %v983_v12 = vand.u32 4294901760, %v2303_v24 }
  0x7f   : > { %853 = vmatpush.xpose.msrb.mxu2 %v2208_v10 }
  0x80   : > { %v984_v28 = vsub.f32 %v2303_v24, %v983_v12  ;;  %281 = vperm.xlu0 %1737, %v267_v53  }
  0x81   : > { %749 = vmatpush.xpose.msrb.mxu0 %v2581_v17  ;;  %802 = vmatpush.xpose.msrb.mxu1 %v1905_v59  ;;  %v979_v59 = vand.u32 4294901760, %v978_v20  ;;  %v2584_v17 = vand.u32 4294901760, %v2005_v34  ;;  %v2586_v34 = vand.u32 4294901760, %v1993_v7 }
  0x82   : > { %968 = vmatpush.xpose.msrb.mxu3 %v967_v50  ;;  %v2583_v50 = vand.u32 4294901760, %v1985_v1  ;;  %v985_v48 = vand.u32 4294901760, %v984_v28 }
  0x83   : > { %855 = vmatpush.xpose.msrb.mxu2 %v2227_v15 }
  0x85   : > { %753 = vmatpush.xpose.msrb.mxu0 %v2582_v45  ;;  %804 = vmatpush.xpose.msrb.mxu1 %v1914_v0  ;;  %v990_v0 = vsub.f32 %v2316_v35, %v989_v3 }
  0x86   : > { %974 = vmatpush.xpose.msrb.mxu3 %v973_v52 }
  0x87   : > { %857 = vmatpush.xpose.msrb.mxu2 %v2252_v25  ;;  %v991_v1 = vand.u32 4294901760, %v990_v0 }
  0x89   : > { %757 = vmatpush.xpose.msrb.mxu0 %v2583_v50  ;;  %806 = vmatpush.xpose.msrb.mxu1 %v1928_v6  ;;  %v2585_v6 = vand.u32 4294901760, %v2022_v55  ;;  %v2598_v55 = vld [vmem:[#allocation4_spill] sm:$0xff] }
  0x8a   : > { %980 = vmatpush.xpose.msrb.mxu3 %v979_v59 }
  0x8b   : > { %859 = vmatpush.xpose.msrb.mxu2 %v2272_v39 }
  0x8d   : > { %761 = vmatpush.xpose.msrb.mxu0 %v2584_v17  ;;  %808 = vmatpush.xpose.msrb.mxu1 %v1949_v29  ;;  %v2587_v29 = vand.u32 4294901760, %v2009_v36 }
  0x8e   : > { %986 = vmatpush.xpose.msrb.mxu3 %v985_v48 }
  0x8f   : > { %861 = vmatpush.xpose.msrb.mxu2 %v2288_v37 }
  0x91   : > { %765 = vmatpush.xpose.msrb.mxu0 %v2585_v6  ;;  %810 = vmatpush.xpose.msrb.mxu1 %v1964_v47  ;;  %v2588_v47 = vand.u32 4294901760, %v2028_v58 }
  0x92   : > { %992 = vmatpush.xpose.msrb.mxu3 %v991_v1 }
  0x93   : > { %863 = vmatpush.xpose.msrb.mxu2 %v2305_v61 }
  0x94   : > { %767 = vmatmul.f32.vlgmr.msrb.gmra.mxu0 %v2047_v30 }
  0x95   : > { %1012 = vmatpush.xpose.msra.mxu0 %v1993_v7  ;;  %812 = vmatpush.xpose.msrb.mxu1 %v1981_v62  ;;  %v2590_v62 = vand.u32 4294901760, %v2081_v22  ;;  %v2592_v7 = vld [vmem:[#allocation6_spill] sm:$0xff] }
  0x96   : > { %1218 = vmatpush.xpose.msra.mxu3 %v1973_v54  ;;  %869 = vmatmul.f32.vlgmr.msrb.gmra.mxu2 %v2094_v26 }
  0x97   : > { %1139 = vmatpush.xpose.msra.mxu2 %v2586_v34  ;;  %994 = vmatmul.f32.vlgmr.msrb.gmra.mxu3 %v2047_v30 }
  0x99   : > { %1015 = vmatpush.xpose.msra.mxu0 %v2009_v36  ;;  %814 = vmatpush.xpose.msrb.mxu1 %v2001_v27  ;;  %v2593_v27 = vand.u32 4294901760, %v2592_v7  ;;  %v2594_v36 = vand.u32 4294901760, %v2153_v63 }
  0x9a   : > { %1220 = vmatpush.xpose.msra.mxu3 %v1989_v5 }
  0x9b   : > { %1143 = vmatpush.xpose.msra.mxu2 %v2587_v29 }
  0x9c   : > { %816 = vmatmul.f32.vlgmr.msrb.gmra.mxu1 %v2047_v30  ;;  %771 = vmatmul.f32.gmra.mxu0 %v2096_v46 }
  0x9d   : > { %1018 = vmatpush.xpose.msra.mxu0 %v2028_v58  ;;  %1080 = vmatpush.xpose.msra.mxu1 %v1973_v54  ;;  %v2589_v54 = vand.u32 4294901760, %v2055_v44  ;;  %v2599_v58 = vld [vmem:[#allocation3_spill] sm:$0xff] }
  0x9e   : > { %1222 = vmatpush.xpose.msra.mxu3 %v2011_v40  ;;  %877 = vmatmul.f32.gmra.mxu2 %v2143_v13 }
  0x9f   : > { %1147 = vmatpush.xpose.msra.mxu2 %v2588_v47  ;;  %998 = vmatmul.f32.gmra.mxu3 %v2096_v46 }
  0xa1   : > { %1021 = vmatpush.xpose.msra.mxu0 %v2055_v44  ;;  %1082 = vmatpush.xpose.msra.mxu1 %v1989_v5  ;;  %v2591_v5 = vand.u32 4294901760, %v2109_v43  ;;  %v2601_v44 = vld [vmem:[#allocation5_spill] sm:$0xff] }
  0xa2   : > { %1224 = vmatpush.xpose.msra.mxu3 %v2030_v21 }
  0xa3   : > { %1151 = vmatpush.xpose.msra.mxu2 %v2589_v54 }
  0xa4   : > { %820 = vmatmul.f32.gmra.mxu1 %v2096_v46  ;;  %775 = vmatmul.f32.gmra.mxu0 %v2145_v60 }
  0xa5   : > { %1024 = vmatpush.xpose.msra.mxu0 %v2081_v22  ;;  %1084 = vmatpush.xpose.msra.mxu1 %v2011_v40  ;;  %v2595_v40 = vand.u32 4294901760, %v2179_v38 }
  0xa6   : > { %1226 = vmatpush.xpose.msra.mxu3 %v2058_v51  ;;  %885 = vmatmul.f32.gmra.mxu2 %v2193_v49 }
  0xa7   : > { %1155 = vmatpush.xpose.msra.mxu2 %v2590_v62  ;;  %1002 = vmatmul.f32.gmra.mxu3 %v2145_v60 }
  0xa9   : > { %1027 = vmatpush.xpose.msra.mxu0 %v2109_v43  ;;  %1086 = vmatpush.xpose.msra.mxu1 %v2030_v21  ;;  %v2600_v21 = vld [vmem:[#allocation7_spill] sm:$0xff] }
  0xaa   : > { %1228 = vmatpush.xpose.msra.mxu3 %v2083_v11 }
  0xab   : > { %1159 = vmatpush.xpose.msra.mxu2 %v2591_v5 }
  0xac   : > { %824 = vmatmul.f32.gmra.mxu1 %v2145_v60  ;;  %779 = vmatmul.f32.gmra.mxu0 %v2195_v8 }
  0xad   : > { %1030 = vmatpush.xpose.msra.mxu0 %v2592_v7  ;;  %1088 = vmatpush.xpose.msra.mxu1 %v2058_v51  ;;  %v2596_v51 = vand.u32 4294901760, %v2206_v14 }
  0xae   : > { %1230 = vmatpush.xpose.msra.mxu3 %v2104_v32  ;;  %893 = vmatmul.f32.gmra.mxu2 %v2239_v9 }
  0xaf   : > { %1163 = vmatpush.xpose.msra.mxu2 %v2593_v27  ;;  %1006 = vmatmul.f32.gmra.mxu3 %v2195_v8 }
  0xb1   : > { %1033 = vmatpush.xpose.msra.mxu0 %v2153_v63  ;;  %1090 = vmatpush.xpose.msra.mxu1 %v2083_v11  ;;  %v2602_v63 = vld [vmem:[#allocation9_spill] sm:$0xff]  ;;  %v2604_v11 = vld [vmem:[#allocation10_spill] sm:$0xff] }
  0xb2   : > { %1232 = vmatpush.xpose.msra.mxu3 %v2127_v31 }
  0xb3   : > { %1167 = vmatpush.xpose.msra.mxu2 %v2594_v36 }
  0xb4   : > { %828 = vmatmul.f32.gmra.mxu1 %v2195_v8 }
  0xb5   : > { %1036 = vmatpush.xpose.msra.mxu0 %v2179_v38  ;;  %1092 = vmatpush.xpose.msra.mxu1 %v2104_v32  ;;  %v2597_v32 = vld [vmem:[#allocation2_spill] sm:$0xff] }
  0xb6   : > { %1234 = vmatpush.xpose.msra.mxu3 %v2155_v56 }
  0xb7   : > { %1171 = vmatpush.xpose.msra.mxu2 %v2595_v40 }
  0xb9   : > { %1039 = vmatpush.xpose.msra.mxu0 %v2206_v14  ;;  %1094 = vmatpush.xpose.msra.mxu1 %v2127_v31 }
  0xba   : > { %1236 = vmatpush.xpose.msra.mxu3 %v2181_v41 }
  0xbb   : > { %1175 = vmatpush.xpose.msra.mxu2 %v2596_v51 }
  0xbd   : > { %1042 = vmatpush.xpose.msra.mxu0 %v2231_v19  ;;  %1096 = vmatpush.xpose.msra.mxu1 %v2155_v56 }
  0xbe   : > { %1238 = vmatpush.xpose.msra.mxu3 %v2208_v10 }
  0xbf   : > { %1179 = vmatpush.xpose.msra.mxu2 %v959_v4 }
  0xc1   : > { %1045 = vmatpush.xpose.msra.mxu0 %v2246_v33  ;;  %1098 = vmatpush.xpose.msra.mxu1 %v2181_v41 }
  0xc2   : > { %1240 = vmatpush.xpose.msra.mxu3 %v2227_v15 }
  0xc3   : > { %1183 = vmatpush.xpose.msra.mxu2 %v965_v2 }
  0xc5   : > { %1048 = vmatpush.xpose.msra.mxu0 %v2270_v57  ;;  %1100 = vmatpush.xpose.msra.mxu1 %v2208_v10 }
  0xc6   : > { %1242 = vmatpush.xpose.msra.mxu3 %v2252_v25 }
  0xc7   : > { %1187 = vmatpush.xpose.msra.mxu2 %v971_v18 }
  0xc9   : > { %1051 = vmatpush.xpose.msra.mxu0 %v2286_v16  ;;  %1102 = vmatpush.xpose.msra.mxu1 %v2227_v15 }
  0xca   : > { %1244 = vmatpush.xpose.msra.mxu3 %v2272_v39 }
  0xcb   : > { %1191 = vmatpush.xpose.msra.mxu2 %v977_v42 }
  0xcd   : > { %1054 = vmatpush.xpose.msra.mxu0 %v2303_v24  ;;  %1104 = vmatpush.xpose.msra.mxu1 %v2252_v25 }
  0xce   : > { %1246 = vmatpush.xpose.msra.mxu3 %v2288_v37 }
  0xcf   : > { %1195 = vmatpush.xpose.msra.mxu2 %v983_v12 }
  0xd1   : > { %1057 = vmatpush.xpose.msra.mxu0 %v2316_v35  ;;  %1106 = vmatpush.xpose.msra.mxu1 %v2272_v39 }
  0xd2   : > { %1248 = vmatpush.xpose.msra.mxu3 %v2305_v61 }
  0xd3   : > { %1199 = vmatpush.xpose.msra.mxu2 %v989_v3 }
  0xd4   : > { %1060 = vmatmul.f32.vlgmr.msra.gmra.mxu0 %v2597_v32 }
  0xd5   : > { %1108 = vmatpush.xpose.msra.mxu1 %v2288_v37  ;;  %1250 = vmatmul.f32.vlgmr.msra.gmra.mxu3 %v2047_v30 }
  0xd6   : > { %1201 = vmatmul.f32.vlgmr.msra.gmra.mxu2 %v2047_v30  ;;  %v2603_v30 = vld [vmem:[#allocation8_spill] sm:$0xff] }
  0xd7   : > { %v436_v22 = vpop.f32.mrf.mxu0 }
  0xd9   : > { %1110 = vmatpush.xpose.msra.mxu1 %v2305_v61  ;;  %v627_v31 = vpop.f32.mrf.mxu2 }
  0xda   : > { %v681_v13 = vpop.f32.mrf.mxu3 }
  0xdc   : > { %1065 = vmatmul.f32.gmra.mxu0 %v2598_v55  ;;  %1114 = vmatmul.f32.vlgmr.msra.gmra.mxu1 %v2599_v58 }
  0xdd   : > { %1254 = vmatmul.f32.gmra.mxu3 %v2096_v46 }
  0xde   : > { %1205 = vmatmul.f32.gmra.mxu2 %v2096_v46  ;;  %v561_v46 = vpop.f32.mrf.mxu1 }
  0xdf   : > { %v444_v26 = vpop.f32.mrf.mxu0 }
  0xe1   : > { %v632_v14 = vpop.f32.mrf.mxu2 }
  0xe2   : > { %v687_v39 = vpop.f32.mrf.mxu3 }
  0xe4   : > { %1070 = vmatmul.f32.gmra.mxu0 %v2600_v21  ;;  %1120 = vmatmul.f32.gmra.mxu1 %v2601_v44 }
  0xe5   : > { %1258 = vmatmul.f32.gmra.mxu3 %v2145_v60 }
  0xe6   : > { %1209 = vmatmul.f32.gmra.mxu2 %v2145_v60  ;;  %v565_v43 = vpop.f32.mrf.mxu1  ;;  %v2464_v38 = vpop.permute.xlu1 %276 }
  0xe7   : > { %v452_v41 = vpop.f32.mrf.mxu0  ;;  %v445_v15 = vadd.f32 %v444_v26, %v2464_v38 }
  0xe9   : > { %v637_v25 = vpop.f32.mrf.mxu2  ;;  %v566_v2 = vadd.f32 %v565_v43, %v445_v15 }
  0xea   : > { %v2462_v60 = vpop.permute.xlu0 %286  ;;  %v693_v37 = vpop.f32.mrf.mxu3 }
  0xeb   : > { %v633_v61 = vadd.f32 %v632_v14, %v566_v2 }
  0xec   : > { %1075 = vmatmul.f32.gmra.mxu0 %v2602_v63  ;;  %1126 = vmatmul.f32.gmra.mxu1 %v2603_v30 }
  0xed   : > { %1262 = vmatmul.f32.gmra.mxu3 %v2195_v8  ;;  %v688_v35 = vadd.f32 %v687_v39, %v633_v61 }
  0xee   : > { %1213 = vmatmul.f32.gmra.mxu2 %v2195_v8  ;;  %v569_v4 = vpop.f32.mrf.mxu1  ;;  %v2468_v8 = vpop.permute.xlu1 %271 }
  0xef   : > { %v460_v56 = vpop.f32.mrf.mxu0  ;;  %v437_v9 = vadd.f32 %v436_v22, %v2468_v8 }
  0xf0   : > { %v461_v24 = vadd.f32 %v460_v56, %v2462_v60 }
  0xf1   : > { %v562_v42 = vadd.f32 %v561_v46, %v437_v9  ;;  %v642_v28 = vpop.f32.mrf.mxu2 }
  0xf2   : > { %v2466_v57 = vpop.permute.xlu0 %281  ;;  %v699_v50 = vpop.f32.mrf.mxu3 }
  0xf3   : > { %v453_v19 = vadd.f32 %v452_v41, %v2466_v57  ;;  %v628_v20 = vadd.f32 %v627_v31, %v562_v42 }
  0xf4   : > { %1132 = vmatmul.f32.gmra.mxu1 %v2604_v11 }
  0xf5   : > { %v570_v16 = vadd.f32 %v569_v4, %v453_v19  ;;  %v682_v3 = vadd.f32 %v681_v13, %v628_v20 }
  0xf6   : > { %v573_v49 = vpop.f32.mrf.mxu1 }
  0xf7   : > { %v638_v52 = vadd.f32 %v637_v25, %v570_v16  ;;  %v574_v59 = vadd.f32 %v573_v49, %v461_v24 }
  0xf9   : > { %v694_v23 = vadd.f32 %v693_v37, %v638_v52  ;;  %v643_v53 = vadd.f32 %v642_v28, %v574_v59  ;;  %v264_v37 = vld [vmem:[%s2528_s3] sm:$0xf] }
  0xfa   : > { %v1282_v42 = vsel %vm1280_vm1, %v264_v37, 0 }
  0xfb   : > { %v700_v29 = vadd.f32 %v699_v50, %v643_v53  ;;  %v2483_v24 = vand.u32 4294901760, %v1282_v42 }
  0xfd   : > { %v2487_v61 = vsub.f32 %v1282_v42, %v2483_v24 }
 0x111   : > { %v768_v10 = vpop.f32.mrf.mxu0 }
 0x112   : > { %v769_v17 = vadd.f32 %v768_v10, %v682_v3 }
 0x119   : > { %v817_v33 = vpop.f32.mrf.mxu1  ;;  %v772_v18 = vpop.f32.mrf.mxu0 }
 0x11a   : > { %v773_v48 = vadd.f32 %v772_v18, %v688_v35  ;;  %v818_v54 = vadd.f32 %v817_v33, %v769_v17  ;;  %v2474_v5 = vpop.f32.mrf.mxu3  ;;  %v2476_v36 = vpop.f32.mrf.mxu2  ;;  %v2490_v35 = vand.u32 4294901760, %v2487_v61 }
 0x11b   : > { %v871_v3 = vadd.f32 %v2476_v36, %v2468_v8 }
 0x11c   : > { %v1266_v40 = vmax.f32 %v818_v54, 0.0 }
 0x11e   : > { %v1302_v21 = vand.u32 4294901760, %v1266_v40 }
 0x120   : > { %v1344_v46 = vsub.f32 %v1266_v40, %v1302_v21 }
 0x121   : > { %v821_v12 = vpop.f32.mrf.mxu1  ;;  %v776_v45 = vpop.f32.mrf.mxu0 }
 0x122   : > { %v777_v0 = vadd.f32 %v776_v45, %v694_v23  ;;  %v822_v6 = vadd.f32 %v821_v12, %v773_v48  ;;  %v2478_v11 = vpop.f32.mrf.mxu3  ;;  %v878_v41 = vpop.f32.mrf.mxu2  ;;  %v1345_v49 = vand.u32 4294901760, %v1344_v46  ;;  %v1307_v45 = vsub.f32 %v2487_v61, %v2490_v35 }
 0x123   : > { %v879_v28 = vadd.f32 %v878_v41, %v2464_v38 }
 0x124   : > { %v1268_v7 = vmax.f32 %v822_v6, 0.0  ;;  %v1346_v15 = vsub.f32 %v1344_v46, %v1345_v49  ;;  %v2496_v59 = vand.u32 4294901760, %v1307_v45  ;;  %v996_v6 = vadd.f32 %v2474_v5, %v871_v3 }
 0x126   : > { %v1300_v55 = vand.u32 4294901760, %v1268_v7  ;;  %v1347_v25 = vand.u32 4294901760, %v1346_v15 }
 0x128   : > { %v1338_v30 = vsub.f32 %v1268_v7, %v1300_v55 }
 0x129   : > { %v825_v1 = vpop.f32.mrf.mxu1  ;;  %v780_v47 = vpop.f32.mrf.mxu0 }
 0x12a   : > { %v826_v34 = vadd.f32 %v825_v1, %v777_v0  ;;  %v781_v27 = vadd.f32 %v780_v47, %v700_v29  ;;  %v1339_v31 = vand.u32 4294901760, %v1338_v30  ;;  %v1003_v19 = vpop.f32.mrf.mxu3  ;;  %v886_v33 = vpop.f32.mrf.mxu2  ;;  %v1000_v0 = vadd.f32 %v2478_v11, %v879_v28 }
 0x12b   : > { %v887_v53 = vadd.f32 %v886_v33, %v2466_v57 }
 0x12c   : > { %v1270_v62 = vmax.f32 %v826_v34, 0.0  ;;  %v1340_v10 = vsub.f32 %v1338_v30, %v1339_v31 }
 0x12d   : > { %v1004_v29 = vadd.f32 %v1003_v19, %v887_v53 }
 0x12e   : > { %v1298_v51 = vand.u32 4294901760, %v1270_v62  ;;  %v1341_v9 = vand.u32 4294901760, %v1340_v10 }
 0x130   : > { %v1332_v44 = vsub.f32 %v1270_v62, %v1298_v51 }
 0x131   : > { %v829_v32 = vpop.f32.mrf.mxu1 }
 0x132   : > { %v830_v58 = vadd.f32 %v829_v32, %v781_v27  ;;  %v1333_v43 = vand.u32 4294901760, %v1332_v44  ;;  %v1007_v2 = vpop.f32.mrf.mxu3  ;;  %v894_v18 = vpop.f32.mrf.mxu2 }
 0x133   : > { %v895_v27 = vadd.f32 %v894_v18, %v2462_v60  ;;  %v1274_v60 = vld [vmem:[%s2529_s4] sm:$0xf] }
 0x134   : > { %v1272_v63 = vmax.f32 %v830_v58, 0.0  ;;  %v1334_v13 = vsub.f32 %v1332_v44, %v1333_v43  ;;  %1277 = vperm.xlu2 %1739, %v1274_v60  }
 0x135   : > { %v1008_v58 = vadd.f32 %v1007_v2, %v895_v27 }
 0x136   : > { %v1296_v22 = vand.u32 4294901760, %v1272_v63  ;;  %v1335_v39 = vand.u32 4294901760, %v1334_v13 }
 0x138   : > { %v1326_v26 = vsub.f32 %v1272_v63, %v1296_v22  ;;  %1297 = vmatpush.msrb.mxu0 %v1296_v22  ;;  %1397 = vmatpush.msrb.mxu3 %v1296_v22 }
 0x13a   : > { %v1327_v4 = vand.u32 4294901760, %v1326_v26  ;;  %1299 = vmatpush.msrb.mxu0 %v1298_v51  ;;  %1368 = vmatpush.msrb.mxu2 %v1326_v26 }
 0x13b   : > { %1399 = vmatpush.msrb.mxu3 %v1298_v51 }
 0x13c   : > { %v1328_v56 = vsub.f32 %v1326_v26, %v1327_v4  ;;  %1301 = vmatpush.msrb.mxu0 %v1300_v55  ;;  %1371 = vmatpush.msrb.mxu2 %v1332_v44 }
 0x13d   : > { %1401 = vmatpush.msrb.mxu3 %v1300_v55 }
 0x13e   : > { %1303 = vmatpush.msrb.mxu0 %v1302_v21  ;;  %1374 = vmatpush.msrb.mxu2 %v1338_v30  ;;  %v1329_v14 = vand.u32 4294901760, %v1328_v56 }
 0x13f   : > { %1403 = vmatpush.msrb.mxu3 %v1302_v21  ;;  %1309 = vmatmul.f32.vlgmr.msrb.gmra.mxu0 %v2496_v59 }
 0x140   : > { %1426 = vmatpush.msra.mxu0 %v1327_v4  ;;  %1330 = vmatpush.msrb.mxu1 %v1329_v14 }
 0x141   : > { %1377 = vmatpush.msrb.mxu2 %v1344_v46  ;;  %1407 = vmatmul.f32.vlgmr.msrb.gmra.mxu3 %v2490_v35 }
 0x142   : > { %1430 = vmatpush.msra.mxu0 %v1333_v43  ;;  %1336 = vmatpush.msrb.mxu1 %v1335_v39 }
 0x143   : > { %1380 = vmatmul.f32.vlgmr.msrb.gmra.mxu2 %v2487_v61 }
 0x144   : > { %1434 = vmatpush.msra.mxu0 %v1339_v31  ;;  %1342 = vmatpush.msrb.mxu1 %v1341_v9 }
 0x146   : > { %1438 = vmatpush.msra.mxu0 %v1345_v49  ;;  %1348 = vmatpush.msrb.mxu1 %v1347_v25 }
 0x147   : > { %1350 = vmatmul.f32.vlgmr.msrb.gmra.mxu1 %v2483_v24  ;;  %1440 = vmatmul.f32.vlgmr.msra.gmra.mxu0 %v2483_v24 }
 0x148   : > { %1457 = vmatpush.msra.mxu1 %v1296_v22 }
 0x14a   : > { %1459 = vmatpush.msra.mxu1 %v1298_v51 }
 0x14c   : > { %1461 = vmatpush.msra.mxu1 %v1300_v55 }
 0x14e   : > { %1463 = vmatpush.msra.mxu1 %v1302_v21 }
 0x14f   : > { %1465 = vmatmul.f32.vlgmr.msra.gmra.mxu1 %v2483_v24 }
 0x151   : > { %v1061_v16 = vpop.f32.mrf.mxu0 }
 0x152   : > { %v1062_v38 = vadd.f32 %v1061_v16, %v996_v6 }
 0x158   : > { %v1251_v52 = vpop.f32.mrf.mxu3 }
 0x159   : > { %v1066_v20 = vpop.f32.mrf.mxu0  ;;  %v1115_v12 = vpop.f32.mrf.mxu1 }
 0x15a   : > { %v1202_v23 = vpop.f32.mrf.mxu2  ;;  %v1067_v34 = vadd.f32 %v1066_v20, %v1000_v0  ;;  %v1116_v54 = vadd.f32 %v1115_v12, %v1062_v38 }
 0x15c   : > { %v1203_v57 = vadd.f32 %v1202_v23, %v1116_v54 }
 0x15e   : > { %v1252_v44 = vadd.f32 %v1251_v52, %v1203_v57 }
 0x160   : > { %v1255_v50 = vpop.f32.mrf.mxu3  ;;  %v1267_v41 = vmax.f32 %v1252_v44, 0.0 }
 0x161   : > { %v1121_v48 = vpop.f32.mrf.mxu1  ;;  %v1071_v1 = vpop.f32.mrf.mxu0 }
 0x162   : > { %v1206_v17 = vpop.f32.mrf.mxu2  ;;  %v1122_v47 = vadd.f32 %v1121_v48, %v1067_v34  ;;  %v1072_v62 = vadd.f32 %v1071_v1, %v1004_v29  ;;  %v1487_v49 = vand.u32 4294901760, %v1267_v41 }
 0x164   : > { %v1207_v36 = vadd.f32 %v1206_v17, %v1122_v47  ;;  %v1529_v19 = vsub.f32 %v1267_v41, %v1487_v49 }
 0x166   : > { %v1256_v5 = vadd.f32 %v1255_v50, %v1207_v36  ;;  %v1530_v37 = vand.u32 4294901760, %v1529_v19 }
 0x168   : > { %v1259_v8 = vpop.f32.mrf.mxu3  ;;  %v1269_v11 = vmax.f32 %v1256_v5, 0.0  ;;  %v1531_v12 = vsub.f32 %v1529_v19, %v1530_v37 }
 0x169   : > { %v1127_v7 = vpop.f32.mrf.mxu1  ;;  %v1076_v55 = vpop.f32.mrf.mxu0 }
 0x16a   : > { %v1128_v40 = vadd.f32 %v1127_v7, %v1072_v62  ;;  %v1210_v51 = vpop.f32.mrf.mxu2  ;;  %v1077_v63 = vadd.f32 %v1076_v55, %v1008_v58  ;;  %v1485_v56 = vand.u32 4294901760, %v1269_v11  ;;  %v1532_v45 = vand.u32 4294901760, %v1531_v12 }
 0x16c   : > { %v1211_v32 = vadd.f32 %v1210_v51, %v1128_v40  ;;  %v1523_v39 = vsub.f32 %v1269_v11, %v1485_v56 }
 0x16e   : > { %v1260_v21 = vadd.f32 %v1259_v8, %v1211_v32  ;;  %v1524_v2 = vand.u32 4294901760, %v1523_v39 }
 0x170   : > { %v1271_v30 = vmax.f32 %v1260_v21, 0.0  ;;  %v1263_v43 = vpop.f32.mrf.mxu3  ;;  %v1525_v52 = vsub.f32 %v1523_v39, %v1524_v2 }
 0x171   : > { %v1133_v22 = vpop.f32.mrf.mxu1 }
 0x172   : > { %v1134_v46 = vadd.f32 %v1133_v22, %v1077_v63  ;;  %v1214_v26 = vpop.f32.mrf.mxu2  ;;  %v1483_v4 = vand.u32 4294901760, %v1271_v30  ;;  %v1526_v23 = vand.u32 4294901760, %v1525_v52 }
 0x174   : > { %v1215_v31 = vadd.f32 %v1214_v26, %v1134_v46  ;;  %v1517_v14 = vsub.f32 %v1271_v30, %v1483_v4 }
 0x176   : > { %v1264_v13 = vadd.f32 %v1263_v43, %v1215_v31  ;;  %v1518_v33 = vand.u32 4294901760, %v1517_v14 }
 0x178   : > { %v1273_v10 = vmax.f32 %v1264_v13, 0.0  ;;  %v1519_v16 = vsub.f32 %v1517_v14, %v1518_v33 }
 0x17a   : > { %v1481_v15 = vand.u32 4294901760, %v1273_v10  ;;  %v1520_v20 = vand.u32 4294901760, %v1519_v16 }
 0x17c   : > { %v1511_v9 = vsub.f32 %v1273_v10, %v1481_v15  ;;  %1482 = vmatpush.msra.mxu2 %v1481_v15  ;;  %1582 = vmatpush.msrb.mxu1 %v1481_v15 }
 0x17e   : > { %v1512_v25 = vand.u32 4294901760, %v1511_v9  ;;  %1484 = vmatpush.msra.mxu2 %v1483_v4  ;;  %1553 = vmatpush.msrb.mxu0 %v1511_v9 }
 0x17f   : > { %1584 = vmatpush.msrb.mxu1 %v1483_v4 }
 0x180   : > { %v1513_v18 = vsub.f32 %v1511_v9, %v1512_v25  ;;  %1486 = vmatpush.msra.mxu2 %v1485_v56  ;;  %1556 = vmatpush.msrb.mxu0 %v1517_v14 }
 0x181   : > { %1586 = vmatpush.msrb.mxu1 %v1485_v56 }
 0x182   : > { %1488 = vmatpush.msra.mxu2 %v1487_v49  ;;  %1559 = vmatpush.msrb.mxu0 %v1523_v39  ;;  %v1514_v42 = vand.u32 4294901760, %v1513_v18 }
 0x183   : > { %1588 = vmatpush.msrb.mxu1 %v1487_v49  ;;  %1494 = vmatmul.f32.vlgmr.msra.gmra.mxu2 %v2496_v59 }
 0x184   : > { %1611 = vmatpush.msrb.mxu2 %v1512_v25  ;;  %1515 = vmatpush.msra.mxu3 %v1514_v42 }
 0x185   : > { %1562 = vmatpush.msrb.mxu0 %v1529_v19  ;;  %1592 = vmatmul.f32.vlgmr.msrb.gmra.mxu1 %v2490_v35 }
 0x186   : > { %1615 = vmatpush.msrb.mxu2 %v1518_v33  ;;  %1565 = vmatmul.f32.vlgmr.msrb.gmra.mxu0 %v2487_v61 }
 0x187   : > { %1521 = vmatpush.msra.mxu3 %v1520_v20 }
 0x188   : > { %1619 = vmatpush.msrb.mxu2 %v1524_v2 }
 0x189   : > { %1527 = vmatpush.msra.mxu3 %v1526_v23 }
 0x18a   : > { %1623 = vmatpush.msrb.mxu2 %v1530_v37 }
 0x18b   : > { %1533 = vmatpush.msra.mxu3 %v1532_v45  ;;  %1625 = vmatmul.f32.vlgmr.msrb.gmra.mxu2 %v2483_v24 }
 0x18c   : > { %1535 = vmatmul.f32.vlgmr.msra.gmra.mxu3 %v2483_v24 }
 0x18d   : > { %1642 = vmatpush.msrb.mxu3 %v1481_v15 }
 0x18e   : > { %v1278_v3 = vpop.permute.xlu2 %1277 }
 0x18f   : > { %1644 = vmatpush.msrb.mxu3 %v1483_v4 }
 0x191   : > { %1646 = vmatpush.msrb.mxu3 %v1485_v56 }
 0x193   : > { %1648 = vmatpush.msrb.mxu3 %v1487_v49 }
 0x194   : > { %1650 = vmatmul.f32.vlgmr.msrb.gmra.mxu3 %v2483_v24 }
 0x1bc   : > { %v1310_v61 = vpop.f32.mrf.mxu0 }
 0x1bd   : > { %v1311_v48 = vadd.f32 %v1310_v61, %v1278_v3 }
 0x1c4   : > { %v1351_v59 = vpop.f32.mrf.mxu1  ;;  %v1408_v35 = vpop.f32.mrf.mxu3 }
 0x1c5   : > { %v1441_v50 = vpop.f32.mrf.mxu0  ;;  %v1352_v53 = vadd.f32 %v1351_v59, %v1311_v48 }
 0x1c6   : > { %v1381_v28 = vpop.f32.mrf.mxu2 }
 0x1c7   : > { %v1382_v6 = vadd.f32 %v1381_v28, %v1352_v53 }
 0x1c9   : > { %v1409_v24 = vadd.f32 %v1408_v35, %v1382_v6 }
 0x1cb   : > { %v1442_v8 = vadd.f32 %v1441_v50, %v1409_v24 }
 0x1cc   : > { %v1466_v0 = vpop.f32.mrf.mxu1 }
 0x1cd   : > { %v1467_v51 = vadd.f32 %v1466_v0, %v1442_v8 }
 0x202   : > { %v1593_v47 = vpop.f32.mrf.mxu1 }
 0x203   : > { %v1566_v29 = vpop.f32.mrf.mxu0 }
 0x206   : > { %v1495_v17 = vpop.f32.mrf.mxu2 }
 0x207   : > { %v1496_v1 = vadd.f32 %v1495_v17, %v1278_v3 }
 0x20e   : > { %v1626_v62 = vpop.f32.mrf.mxu2 }
 0x20f   : > { %v1536_v34 = vpop.f32.mrf.mxu3 }
 0x210   : > { %v1537_v38 = vadd.f32 %v1536_v34, %v1496_v1 }
 0x212   : > { %v1567_v54 = vadd.f32 %v1566_v29, %v1537_v38 }
 0x214   : > { %v1594_v7 = vadd.f32 %v1593_v47, %v1567_v54 }
 0x216   : > { %v1627_v27 = vadd.f32 %v1626_v62, %v1594_v7 }
 0x217   : > { %v1651_v36 = vpop.f32.mrf.mxu3 }
 0x218   : > { %v1652_v40 = vadd.f32 %v1651_v36, %v1627_v27 }
 0x21a   : > { %v1656_v57 = vrot.slane %v1652_v40, 4 }
 0x21c   : > { %v1658_v32 = vsel %vm1657_vm2, %v1467_v51, %v1656_v57 }
 0x21d   : > { %1660 = vst [vmem:[%s226_s25] sm:$0xff] %v1658_v32 }
 0x21e PF: > { %s15_s18 = sadd.s32 1, %s1746_s18  }
 0x21f   : > { %p12_p5 = scmp.ge.s32.totalorder %s15_s18, 4  }
 0x221   :  { %14 = sbr.rel (!%p12_p5) target bundleno = 1 (0x1), region = 70 }

</bundles_post_ra>
